<compile_context>
chip_gen: v7x
topology: tpu7x:2x2x1
jax: 0.10.0
libtpu: 0.0.40
codegen_flags: <defaults>
</compile_context>

<pallas_src>
import jax
import jax.numpy as jnp
from jax.experimental import pallas as pl
from jax.experimental.pallas import tpu as pltpu


# --------------------------------------------------------------------------
# Pallas kernels
# --------------------------------------------------------------------------
def encoder_embed_kernel(p_ref, w_ref, cls_ref, pos_ref, out_ref):
    # p_ref:   (Bt, N, K) bf16  raw patches for Bt images
    # w_ref:   (K, H)     bf16  patch-embedding weight (resident across the grid)
    # cls_ref: (1, H)     f32   cls_token + pos_embed[0]  (precomputed)
    # pos_ref: (N, H)     f32   pos_embed[1:] + patch_b   (precomputed)
    # out_ref: (Bt, S, H) bf16  encoder output, S = N + 1, CLS at row 0
    Bt, N, K = p_ref.shape
    H = w_ref.shape[1]

    p = p_ref[...].reshape(Bt * N, K)                       # tile-aligned merge (N % 8 == 0)
    emb = jnp.dot(p, w_ref[...], preferred_element_type=jnp.float32)   # (Bt*N, H) on MXU
    emb = emb.reshape(Bt, N, H) + pos_ref[...][None, :, :]  # broadcast pos over batch

    # Dense store of the patch rows, then a single tiny store of the CLS row.
    out_ref[:, 1:N + 1, :] = emb.astype(out_ref.dtype)
    cls = jnp.broadcast_to(cls_ref[...][None, :, :], (Bt, 1, H))
    out_ref[:, 0:1, :] = cls.astype(out_ref.dtype)


def head_kernel(x_ref, gamma_ref, beta_ref, w_ref, b_ref, out_ref):
    # ViTClassifier forward on the CLS token only.
    # x_ref:      (TB, R, H)  bf16 first R (<=16) encoder rows per image; row 0 = CLS
    # gamma/beta: (1, H)      f32  LayerNorm(eps=1e-6) affine
    # w_ref:      (H, Cpad)   bf16 classifier weight, zero-padded to 128 lanes
    # b_ref:      (1, Cpad)   f32  classifier bias, zero-padded
    # out_ref:    (TB, Cpad)  f32  lane-dense logits (sliced to C outside)
    x = x_ref[...][:, 0, :].astype(jnp.float32)             # x[:, 0, :]  (TB, H)
    mean = jnp.mean(x, axis=-1, keepdims=True)
    centered = x - mean
    var = jnp.mean(centered * centered, axis=-1, keepdims=True)   # biased, like nn.LayerNorm
    xn = centered * jax.lax.rsqrt(var + 1e-6)
    y = xn * gamma_ref[...] + beta_ref[...]
    # head_drop: nn.Dropout(p=0.1) is identity in eval mode -> no-op.
    logits = jnp.dot(y.astype(w_ref.dtype), w_ref[...],
                     preferred_element_type=jnp.float32)
    out_ref[...] = logits + b_ref[...]


# --------------------------------------------------------------------------
# Tile-size helpers
# --------------------------------------------------------------------------
def _encoder_batch_tile(B, N, K, H, target_m=256, budget=24 * 1024 * 1024):
    """Largest divisor of B whose per-step VMEM (double-buffered bf16 in/out tiles +
    resident weight/pos) fits the budget; stop once the MXU M dim (Bt*N) is filled."""
    S = N + 1
    best = 1
    for bt in range(1, B + 1):
        if B % bt:
            continue
        per_step = 2 * bt * N * K * 2 + 2 * bt * S * H * 2      # in + out, 2-deep
        resident = K * H * 2 + N * H * 4 + H * 4
        if per_step + resident > budget:
            break
        best = bt
        if bt * N >= target_m:
            break
    return best


def _head_batch_tile(B):
    for t in (256, 128, 64, 32, 16, 8):
        if B % t == 0:
            return t
    return B


# --------------------------------------------------------------------------
# Wrappers
# --------------------------------------------------------------------------
def encoder_embed(patches, patch_w, cls_row, pos_patch):
    # patches: (B, N, K) bf16; returns (B, N+1, H) bf16 with CLS at position 0.
    B, N, K = patches.shape
    _, H = patch_w.shape
    S = N + 1
    Bt = _encoder_batch_tile(B, N, K, H)
    return pl.pallas_call(
        encoder_embed_kernel,
        out_shape=jax.ShapeDtypeStruct((B, S, H), jnp.bfloat16),
        grid=(B // Bt,),
        in_specs=[
            pl.BlockSpec((Bt, N, K), lambda b: (b, 0, 0)),   # per-step patch tile
            pl.BlockSpec((K, H), lambda b: (0, 0)),          # resident weight
            pl.BlockSpec((1, H), lambda b: (0, 0)),          # cls + pos[0]
            pl.BlockSpec((N, H), lambda b: (0, 0)),          # pos[1:] + bias
        ],
        out_specs=pl.BlockSpec((Bt, S, H), lambda b: (b, 0, 0)),
        compiler_params=pltpu.CompilerParams(
            dimension_semantics=("parallel",),     # megacore sharding on v7x
            vmem_limit_bytes=32 * 1024 * 1024,     # safe on v5e/v6e/v7x (64 MiB phys)
        ),
    )(patches, patch_w, cls_row, pos_patch)


def vit_classifier_head(x_enc, gamma, beta, w_pad, b_pad, num_classes):
    B, S, H = x_enc.shape
    c_pad = w_pad.shape[1]
    # 16-row window keeps the bf16 (16,128) sublane tiling aligned while only
    # DMA-ing a small slice (instead of all S rows) per image.
    head_rows = 16 if S >= 16 else S
    TB = _head_batch_tile(B)

    logits_pad = pl.pallas_call(
        head_kernel,
        out_shape=jax.ShapeDtypeStruct((B, c_pad), jnp.float32),
        grid=(B // TB,),
        in_specs=[
            pl.BlockSpec((TB, head_rows, H), lambda i: (i, 0, 0)),  # CLS-row window
            pl.BlockSpec((1, H), lambda i: (0, 0)),
            pl.BlockSpec((1, H), lambda i: (0, 0)),
            pl.BlockSpec((H, c_pad), lambda i: (0, 0)),             # resident weight
            pl.BlockSpec((1, c_pad), lambda i: (0, 0)),
        ],
        out_specs=pl.BlockSpec((TB, c_pad), lambda i: (i, 0)),      # lane-dense logits
        compiler_params=pltpu.CompilerParams(
            dimension_semantics=("parallel",),
            vmem_limit_bytes=32 * 1024 * 1024,
        ),
    )(x_enc, gamma, beta, w_pad, b_pad)
    return logits_pad[:, :num_classes]


# --------------------------------------------------------------------------
# One-time parameter prep (outside the jitted forward)
# --------------------------------------------------------------------------
def prepare_params(params, num_classes):
    H = params["patch_w"].shape[1]
    c_pad = ((num_classes + 127) // 128) * 128
    w_pad = jnp.zeros((H, c_pad), jnp.bfloat16).at[:, :num_classes].set(
        params["cls_w"].astype(jnp.bfloat16))
    b_pad = jnp.zeros((1, c_pad), jnp.float32).at[:, :num_classes].set(
        params["cls_b"].astype(jnp.float32))
    return {
        "patch_w": params["patch_w"].astype(jnp.bfloat16),
        # Fold the patch-embedding bias into the positional embedding once.
        "pos_patch": (params["pos_embed"][1:] + params["patch_b"]).astype(jnp.float32),
        "cls_row": (params["cls_token"] + params["pos_embed"][0:1]).astype(jnp.float32),
        "ln_gamma": params["ln_gamma"].astype(jnp.float32),
        "ln_beta": params["ln_beta"].astype(jnp.float32),
        "cls_w_pad": w_pad,
        "cls_b_pad": b_pad,
    }


# --------------------------------------------------------------------------
# Model forward (glue in plain JAX, jitted so unfold/casts fuse)
# --------------------------------------------------------------------------
def vit_forward(x_nchw, prep, patch_size, num_classes):
    B, Cin, Himg, Wimg = x_nchw.shape
    P = patch_size
    nH, nW = Himg // P, Wimg // P
    N = nH * nW

    # NCHW -> (B, N, C*P*P) unfold, matching Conv2d(stride=P) weight flatten order.
    # TODO(synk): for large images, fold this gather into the kernel's BlockSpec
    # index_map to avoid the extra HBM pass over the image.
    patches = (
        x_nchw.reshape(B, Cin, nH, P, nW, P)
        .transpose(0, 2, 4, 1, 3, 5)
        .reshape(B, N, Cin * P * P)
    ).astype(jnp.bfloat16)

    x_enc = encoder_embed(patches, prep["patch_w"], prep["cls_row"], prep["pos_patch"])

    # ViTClassifier.forward: x[:, 0, :] -> fc_norm -> head_drop -> classifier
    return vit_classifier_head(
        x_enc, prep["ln_gamma"], prep["ln_beta"],
        prep["cls_w_pad"], prep["cls_b_pad"], num_classes,
    )


vit_forward_jit = jax.jit(vit_forward, static_argnums=(2, 3))


# --------------------------------------------------------------------------
# Main
# --------------------------------------------------------------------------
if __name__ == "__main__":
    B, Cin, IMG, P = 2, 4, 16, 4
    HID, NUM_CLASSES = 32, 10
    N = (IMG // P) * (IMG // P)
    S = N + 1
    K = Cin * P * P
    # NOTE: at these toy sizes K=64 / H=32 underfill the MXU (v5e wants 128,
    # v6e/v7x want 256 on the contraction); real ViT (K=H=768) fills it naturally.

    key = jax.random.PRNGKey(0)
    ks = jax.random.split(key, 5)

    params = {
        # synthetic, deterministic encoder params (stand-in for the external encoder)
        "patch_w": jax.random.normal(ks[0], (K, HID), jnp.float32) * 0.02,
        "patch_b": jnp.zeros((1, HID), jnp.float32),
        "cls_token": jax.random.normal(ks[1], (1, HID), jnp.float32) * 0.02,
        "pos_embed": jax.random.normal(ks[2], (S, HID), jnp.float32) * 0.02,
        # ViTClassifier params
        "ln_gamma": jnp.ones((1, HID), jnp.float32),
        "ln_beta": jnp.zeros((1, HID), jnp.float32),
        "cls_w": jax.random.normal(ks[3], (HID, NUM_CLASSES), jnp.float32) * 0.02,
        "cls_b": jnp.zeros((1, NUM_CLASSES), jnp.float32),
    }
    prep = prepare_params(params, NUM_CLASSES)

    x = jax.random.normal(ks[4], (B, Cin, IMG, IMG), jnp.float32)

    logits = vit_forward_jit(x, prep, P, NUM_CLASSES)
    jax.block_until_ready(logits)

    assert logits.shape == (B, NUM_CLASSES)
    assert bool(jnp.all(jnp.isfinite(logits)))
    print("KERNEL_OK")
</pallas_src>

<mosaic_0001>
module attributes {stable_mosaic.version = 11 : i64} {
  func.func @encoder_embed_kernel(%arg0: i32, %arg1: memref<2x16x64xbf16, #tpu.memory_space<vmem>>, %arg2: memref<64x32xbf16, #tpu.memory_space<vmem>>, %arg3: memref<1x32xf32, #tpu.memory_space<vmem>>, %arg4: memref<16x32xf32, #tpu.memory_space<vmem>>, %arg5: memref<2x17x32xbf16, #tpu.memory_space<vmem>>) attributes {dimension_semantics = [#tpu.dimension_semantics<parallel>], iteration_bounds = array<i64: 1>, scalar_prefetch = 0 : i64, scratch_operands = 0 : i64, tpu.core_type = #tpu.core_type<tc>, window_params = [{transform_indices = @transform_0, window_bounds = array<i64: 2, 16, 64>}, {pipeline_mode = #tpu.pipeline_mode<synchronous>, transform_indices = @transform_1, window_bounds = array<i64: 64, 32>}, {pipeline_mode = #tpu.pipeline_mode<synchronous>, transform_indices = @transform_2, window_bounds = array<i64: 1, 32>}, {pipeline_mode = #tpu.pipeline_mode<synchronous>, transform_indices = @transform_3, window_bounds = array<i64: 16, 32>}, {transform_indices = @transform_4, window_bounds = array<i64: 2, 17, 32>}]} {
    %c0 = arith.constant 0 : index
    %c0_0 = arith.constant 0 : index
    %c0_1 = arith.constant 0 : index
    %0 = vector.load %arg1[%c0, %c0_0, %c0_1] : memref<2x16x64xbf16, #tpu.memory_space<vmem>>, vector<2x16x64xbf16>
    %1 = vector.shape_cast %0 : vector<2x16x64xbf16> to vector<32x64xbf16>
    %c0_2 = arith.constant 0 : index
    %c0_3 = arith.constant 0 : index
    %2 = vector.load %arg2[%c0_2, %c0_3] : memref<64x32xbf16, #tpu.memory_space<vmem>>, vector<64x32xbf16>
    %cst = arith.constant dense<0.000000e+00> : vector<32x32xf32>
    %3 = tpu.matmul %1, %2, %cst {dimension_numbers = #tpu.dot_dimension_numbers<[1], [0], [0], [1], [0, 0, 1, 1], [], []>} : vector<32x64xbf16>, vector<64x32xbf16>, vector<32x32xf32> -> vector<32x32xf32>
    %4 = vector.shape_cast %3 : vector<32x32xf32> to vector<2x16x32xf32>
    %c0_4 = arith.constant 0 : index
    %c0_5 = arith.constant 0 : index
    %5 = vector.load %arg4[%c0_4, %c0_5] : memref<16x32xf32, #tpu.memory_space<vmem>>, vector<16x32xf32>
    %6 = vector.shape_cast %5 : vector<16x32xf32> to vector<1x16x32xf32>
    %7 = vector.broadcast %6 : vector<1x16x32xf32> to vector<2x16x32xf32>
    %8 = arith.addf %4, %7 : vector<2x16x32xf32>
    %9 = arith.truncf %8 : vector<2x16x32xf32> to vector<2x16x32xbf16>
    %c0_6 = arith.constant 0 : index
    %c1 = arith.constant 1 : index
    %c0_7 = arith.constant 0 : index
    %10 = vector.load %arg5[%c0_6, %c1, %c0_7] : memref<2x17x32xbf16, #tpu.memory_space<vmem>>, vector<2x16x32xbf16>
    tpu.vector_store %arg5[%c0_6, %c1, %c0_7], %9 {strides = array<i32>} : memref<2x17x32xbf16, #tpu.memory_space<vmem>>, vector<2x16x32xbf16>,
    %c0_8 = arith.constant 0 : index
    %c0_9 = arith.constant 0 : index
    %11 = vector.load %arg3[%c0_8, %c0_9] : memref<1x32xf32, #tpu.memory_space<vmem>>, vector<1x32xf32>
    %12 = vector.shape_cast %11 : vector<1x32xf32> to vector<1x1x32xf32>
    %13 = vector.shape_cast %12 : vector<1x1x32xf32> to vector<1x1x32xf32>
    %14 = vector.broadcast %13 : vector<1x1x32xf32> to vector<2x1x32xf32>
    %15 = arith.truncf %14 : vector<2x1x32xf32> to vector<2x1x32xbf16>
    %c0_10 = arith.constant 0 : index
    %c0_11 = arith.constant 0 : index
    %c0_12 = arith.constant 0 : index
    %16 = vector.load %arg5[%c0_10, %c0_11, %c0_12] : memref<2x17x32xbf16, #tpu.memory_space<vmem>>, vector<2x1x32xbf16>
    tpu.vector_store %arg5[%c0_10, %c0_11, %c0_12], %15 {strides = array<i32>} : memref<2x17x32xbf16, #tpu.memory_space<vmem>>, vector<2x1x32xbf16>,
    return
  }
  func.func @transform_0(%arg0: i32) -> (i32, i32, i32) {
    %c0_i32 = arith.constant 0 : i32
    %c0_i32_0 = arith.constant 0 : i32
    %c0_i32_1 = arith.constant 0 : i32
    return %arg0, %c0_i32, %c0_i32_0 : i32, i32, i32
  }
  func.func @transform_1(%arg0: i32) -> (i32, i32) {
    %c0_i32 = arith.constant 0 : i32
    %c0_i32_0 = arith.constant 0 : i32
    %c0_i32_1 = arith.constant 0 : i32
    return %c0_i32, %c0_i32_0 : i32, i32
  }
  func.func @transform_2(%arg0: i32) -> (i32, i32) {
    %c0_i32 = arith.constant 0 : i32
    %c0_i32_0 = arith.constant 0 : i32
    %c0_i32_1 = arith.constant 0 : i32
    return %c0_i32, %c0_i32_0 : i32, i32
  }
  func.func @transform_3(%arg0: i32) -> (i32, i32) {
    %c0_i32 = arith.constant 0 : i32
    %c0_i32_0 = arith.constant 0 : i32
    %c0_i32_1 = arith.constant 0 : i32
    return %c0_i32, %c0_i32_0 : i32, i32
  }
  func.func @transform_4(%arg0: i32) -> (i32, i32, i32) {
    %c0_i32 = arith.constant 0 : i32
    %c0_i32_0 = arith.constant 0 : i32
    %c0_i32_1 = arith.constant 0 : i32
    return %arg0, %c0_i32, %c0_i32_0 : i32, i32, i32
  }
}

module attributes {stable_mosaic.version = 11 : i64} {
  func.func @head_kernel(%arg0: i32, %arg1: memref<2x16x32xbf16, #tpu.memory_space<vmem>>, %arg2: memref<1x32xf32, #tpu.memory_space<vmem>>, %arg3: memref<1x32xf32, #tpu.memory_space<vmem>>, %arg4: memref<32x128xbf16, #tpu.memory_space<vmem>>, %arg5: memref<1x128xf32, #tpu.memory_space<vmem>>, %arg6: memref<2x128xf32, #tpu.memory_space<vmem>>) attributes {dimension_semantics = [#tpu.dimension_semantics<parallel>], iteration_bounds = array<i64: 1>, scalar_prefetch = 0 : i64, scratch_operands = 0 : i64, tpu.core_type = #tpu.core_type<tc>, window_params = [{transform_indices = @transform_0, window_bounds = array<i64: 2, 16, 32>}, {pipeline_mode = #tpu.pipeline_mode<synchronous>, transform_indices = @transform_1, window_bounds = array<i64: 1, 32>}, {pipeline_mode = #tpu.pipeline_mode<synchronous>, transform_indices = @transform_2, window_bounds = array<i64: 1, 32>}, {pipeline_mode = #tpu.pipeline_mode<synchronous>, transform_indices = @transform_3, window_bounds = array<i64: 32, 128>}, {pipeline_mode = #tpu.pipeline_mode<synchronous>, transform_indices = @transform_4, window_bounds = array<i64: 1, 128>}, {transform_indices = @transform_5, window_bounds = array<i64: 2, 128>}]} {
    %c0 = arith.constant 0 : index
    %c0_0 = arith.constant 0 : index
    %c0_1 = arith.constant 0 : index
    %0 = vector.load %arg1[%c0, %c0_0, %c0_1] : memref<2x16x32xbf16, #tpu.memory_space<vmem>>, vector<2x16x32xbf16>
    %1 = vector.extract_strided_slice %0 {offsets = [0, 0, 0], sizes = [2, 1, 32], strides = [1, 1, 1]} : vector<2x16x32xbf16> to vector<2x1x32xbf16>
    %2 = vector.shape_cast %1 : vector<2x1x32xbf16> to vector<2x32xbf16>
    %3 = arith.extf %2 : vector<2x32xbf16> to vector<2x32xf32>
    %cst = arith.constant dense<0.000000e+00> : vector<2xf32>
    %4 = vector.multi_reduction <add>, %3, %cst [1] : vector<2x32xf32> to vector<2xf32>
    %5 = vector.shape_cast %4 : vector<2xf32> to vector<2x1xf32>
    %cst_2 = arith.constant 3.200000e+01 : f32
    %6 = vector.broadcast %cst_2 : f32 to vector<2x1xf32>
    %7 = arith.divf %5, %6 : vector<2x1xf32>
    %8 = vector.broadcast %7 : vector<2x1xf32> to vector<2x32xf32>
    %9 = arith.subf %3, %8 : vector<2x32xf32>
    %10 = arith.mulf %9, %9 : vector<2x32xf32>
    %cst_3 = arith.constant dense<0.000000e+00> : vector<2xf32>
    %11 = vector.multi_reduction <add>, %10, %cst_3 [1] : vector<2x32xf32> to vector<2xf32>
    %12 = vector.shape_cast %11 : vector<2xf32> to vector<2x1xf32>
    %cst_4 = arith.constant 3.200000e+01 : f32
    %13 = vector.broadcast %cst_4 : f32 to vector<2x1xf32>
    %14 = arith.divf %12, %13 : vector<2x1xf32>
    %cst_5 = arith.constant 9.99999997E-7 : f32
    %15 = vector.broadcast %cst_5 : f32 to vector<2x1xf32>
    %16 = arith.addf %14, %15 : vector<2x1xf32>
    %17 = math.rsqrt %16 : vector<2x1xf32>
    %18 = vector.broadcast %17 : vector<2x1xf32> to vector<2x32xf32>
    %19 = arith.mulf %9, %18 : vector<2x32xf32>
    %c0_6 = arith.constant 0 : index
    %c0_7 = arith.constant 0 : index
    %20 = vector.load %arg2[%c0_6, %c0_7] : memref<1x32xf32, #tpu.memory_space<vmem>>, vector<1x32xf32>
    %21 = vector.broadcast %20 : vector<1x32xf32> to vector<2x32xf32>
    %22 = arith.mulf %19, %21 : vector<2x32xf32>
    %c0_8 = arith.constant 0 : index
    %c0_9 = arith.constant 0 : index
    %23 = vector.load %arg3[%c0_8, %c0_9] : memref<1x32xf32, #tpu.memory_space<vmem>>, vector<1x32xf32>
    %24 = vector.broadcast %23 : vector<1x32xf32> to vector<2x32xf32>
    %25 = arith.addf %22, %24 : vector<2x32xf32>
    %26 = arith.truncf %25 : vector<2x32xf32> to vector<2x32xbf16>
    %c0_10 = arith.constant 0 : index
    %c0_11 = arith.constant 0 : index
    %27 = vector.load %arg4[%c0_10, %c0_11] : memref<32x128xbf16, #tpu.memory_space<vmem>>, vector<32x128xbf16>
    %cst_12 = arith.constant dense<0.000000e+00> : vector<2x128xf32>
    %28 = tpu.matmul %26, %27, %cst_12 {dimension_numbers = #tpu.dot_dimension_numbers<[1], [0], [0], [1], [0, 0, 1, 1], [], []>} : vector<2x32xbf16>, vector<32x128xbf16>, vector<2x128xf32> -> vector<2x128xf32>
    %c0_13 = arith.constant 0 : index
    %c0_14 = arith.constant 0 : index
    %29 = vector.load %arg5[%c0_13, %c0_14] : memref<1x128xf32, #tpu.memory_space<vmem>>, vector<1x128xf32>
    %30 = vector.broadcast %29 : vector<1x128xf32> to vector<2x128xf32>
    %31 = arith.addf %28, %30 : vector<2x128xf32>
    %c0_15 = arith.constant 0 : index
    %c0_16 = arith.constant 0 : index
    %32 = vector.load %arg6[%c0_15, %c0_16] : memref<2x128xf32, #tpu.memory_space<vmem>>, vector<2x128xf32>
    tpu.vector_store %arg6[%c0_15, %c0_16], %31 {strides = array<i32>} : memref<2x128xf32, #tpu.memory_space<vmem>>, vector<2x128xf32>,
    return
  }
  func.func @transform_0(%arg0: i32) -> (i32, i32, i32) {
    %c0_i32 = arith.constant 0 : i32
    %c0_i32_0 = arith.constant 0 : i32
    %c0_i32_1 = arith.constant 0 : i32
    return %arg0, %c0_i32, %c0_i32_0 : i32, i32, i32
  }
  func.func @transform_1(%arg0: i32) -> (i32, i32) {
    %c0_i32 = arith.constant 0 : i32
    %c0_i32_0 = arith.constant 0 : i32
    %c0_i32_1 = arith.constant 0 : i32
    return %c0_i32, %c0_i32_0 : i32, i32
  }
  func.func @transform_2(%arg0: i32) -> (i32, i32) {
    %c0_i32 = arith.constant 0 : i32
    %c0_i32_0 = arith.constant 0 : i32
    %c0_i32_1 = arith.constant 0 : i32
    return %c0_i32, %c0_i32_0 : i32, i32
  }
  func.func @transform_3(%arg0: i32) -> (i32, i32) {
    %c0_i32 = arith.constant 0 : i32
    %c0_i32_0 = arith.constant 0 : i32
    %c0_i32_1 = arith.constant 0 : i32
    return %c0_i32, %c0_i32_0 : i32, i32
  }
  func.func @transform_4(%arg0: i32) -> (i32, i32) {
    %c0_i32 = arith.constant 0 : i32
    %c0_i32_0 = arith.constant 0 : i32
    %c0_i32_1 = arith.constant 0 : i32
    return %c0_i32, %c0_i32_0 : i32, i32
  }
  func.func @transform_5(%arg0: i32) -> (i32, i32) {
    %c0_i32 = arith.constant 0 : i32
    %c0_i32_0 = arith.constant 0 : i32
    return %arg0, %c0_i32 : i32, i32
  }
}

</mosaic_0001>

<bundles_post_ra>
// kernel: vit_forward.3
= control target key start
LH: loop header
LB: loop body
LE: loop exit
PB: predicated region body
PF: predicated region fallthrough
CT: control target
= control target key end

     0   :  { %s346_s0 = inlined_call_operand.vmem [shape: bf16[2,17,32], index: 0, kind: input, shape index: {}]   ;;  %s347_s1 = inlined_call_operand.vmem [shape: f32[1,32], index: 1, kind: input, shape index: {}]   ;;  %s348_s2 = inlined_call_operand.vmem [shape: f32[1,32], index: 2, kind: input, shape index: {}]   ;;  %s349_s3 = inlined_call_operand.vmem [shape: bf16[32,128], index: 3, kind: input, shape index: {}]   ;;  %s350_s4 = inlined_call_operand.vmem [shape: f32[1,128], index: 4, kind: input, shape index: {}]   ;;  %s351_s5 = inlined_call_operand.hbm [shape: f32[2,128], index: 5, kind: output, shape index: {}]  }
   0x1   :  { %v28_v0 = vld [vmem:[%s346_s0] sm:$0xff]   ;;  %v32_v1 = vld [vmem:[%s346_s0 + $0xc] sm:$0xff]  }
   0x2   :  { %29 = vst [vmem:[#allocation2] sm:$0xff] %v28_v0   ;;  %33 = vst [vmem:[#allocation2 + $0x8] sm:$0xff] %v32_v1  }
   0x3   :  { %10 = vsyncpa [#allocation4], 0  ;;  %vm82_vm0 = vcmask 1041409   ;;  %vm85_vm1 = vcmask 254976   ;;  %v249_v18 = vld [vmem:[%s349_s3] sm:$0xff]   ;;  %v277_v19 = vmov 0.0  }
   0x4   :  { %238 = vmatprep.subr.bf16.mxu0 %v277_v19  ;;  %vm278_vm2 = vmmov 0   ;;  %v250_v20 = vld [vmem:[%s349_s3 + $0x8] sm:$0xff]   ;;  %v229_v25 = vld [vmem:[%s347_s1] ss:$0 sm:$0xff]  ;;  %vm166_vm3 = vcmask 261120  }
   0x5   :  { %242 = vmatprep.mubr.msk.bf16.mxu0 %vm278_vm2, %v277_v19  ;;  %239 = vmatpush3.bf16.msra.mxu0 %v249_v18  ;;  %v230_v28 = vld [vmem:[%s348_s2] ss:$0 sm:$0xff]  ;;  %s279_s2 = smov [#allocation3]  }
   0x6   :  { %240 = vmatprep.subr.bf16.mxu0 %v277_v19  ;;  %v231_v41 = vld [vmem:[%s350_s4] ss:$0 sm:$0xff]  ;;  %s217_s29 = sshll.u32 %s279_s2, 4  ;;  %s218_s29 = int_to_ptr.vmem [resolvable:$true] %s217_s29 }
   0x7   :  { %s253_s30 = scalar_lea.vmem %s218_s29, 32  ;;  %p258_p1 = scmp.lt.s32.totalorder %s218_s29, %s218_s29 }
   0x8   :  { %p254_p0 = scmp.ne.s32.totalorder %s218_s29, %s253_s30  ;;  %p259_p2 = scmp.lt.s32.totalorder %s253_s30, %s253_s30 }
   0x9   :  { %v75_v2 = vld [vmem:[#allocation2] ss:$8 sps:$4 sm:$0xff]   ;;  %241 = vmatpush3.bf16.msra.mxu0 %v250_v20 }
   0xa   :  { %v77_v3 = vunpack.c.l.bf16 %v75_v2  ;;  %v78_v4 = vunpack.c.h.bf16 %v75_v2  ;;  %p260_p3 = por %p259_p2, %p258_p1 }
   0xc   :  { %v81_v5 = vrot.slane %v78_v4, 7  ;;  %p261_p4 = pnand %p260_p3, %p254_p0 }
   0xe   :  { %v83_v6 = vsel %vm82_vm0, %v81_v5, %v77_v3 }
   0xf   :  { %v86_v7 = vsel %vm85_vm1, %v83_v6, 0.0 }
  0x10   :  { %87 = vadd.xlane.f32.xlu0 %v86_v7 }
  0x9d   :  { %v88_v8 = vpop.xlane.xlu0 %87 }
  0x9e   :  { %v90_v9 = vmul.f32 0.03125, %v88_v8 }
  0xa0   :  { %v92_v10 = vrot.slane %v90_v9, 1  ;;  %v95_v11 = vsub.f32 %v77_v3, %v90_v9 }
  0xa2   :  { %v96_v12 = vsub.f32 %v78_v4, %v92_v10  ;;  %v97_v14 = vmul.f32 %v95_v11, %v95_v11 }
  0xa4   :  { %v98_v13 = vmul.f32 %v96_v12, %v96_v12 }
  0xa6   :  { %v101_v15 = vrot.slane %v98_v13, 7 }
  0xa8   :  { %v102_v16 = vsel %vm82_vm0, %v101_v15, %v97_v14 }
  0xa9   :  { %v104_v17 = vsel %vm85_vm1, %v102_v16, 0.0 }
  0xaa   :  { %105 = vadd.xlane.f32.xlu0 %v104_v17 }
 0x137   :  { %v106_v21 = vpop.xlane.xlu0 %105 }
 0x138   :  { %v107_v22 = vmul.f32 0.03125, %v106_v21 }
 0x13a   :  { %v108_v23 = vadd.f32 1e-06, %v107_v22 }
 0x13c   :  { %251 = vrsqrt.f32 %v108_v23 }
 0x146   :  { %v252_v24 = vpop.eup %251 }
 0x147   :  { %v111_v26 = vrot.slane %v252_v24, 1  ;;  %v114_v27 = vmul.f32 %v252_v24, %v95_v11 }
 0x149   :  { %v115_v29 = vmul.f32 %v111_v26, %v96_v12  ;;  %v123_v30 = vmul.f32 %v229_v25, %v114_v27 }
 0x14b   :  { %v124_v31 = vmul.f32 %v229_v25, %v115_v29  ;;  %v132_v32 = vadd.f32 %v230_v28, %v123_v30 }
 0x14d   :  { %v133_v33 = vadd.f32 %v230_v28, %v124_v31  ;;  %v134_v34 = vpack.c.bf16 %v132_v32, %v132_v32 }
 0x14f   :  { %v135_v35 = vpack.c.bf16 %v133_v33, %v133_v33  ;;  %v149_v37 = vunpack.c.l.b16 %v134_v34 }
 0x151   :  { %v150_v36 = vunpack.c.l.b16 %v135_v35 }
 0x153   :  { %v151_v38 = vrot.slane %v150_v36, 7 }
 0x155   :  { %v152_v39 = vsel %vm82_vm0, %v151_v38, %v149_v37 }
 0x156   :  { %v153_v40 = vpack.c.b16 %v152_v39, %v152_v39 }
 0x158   :  { %243 = vmatmul.mubr.msk.bf16.vlgmr.msra.gmra.mrb[0].mxu0 %vm166_vm3, %v153_v40 }
 0x22b   :  { %v204_v42 = vpop.f32.mrb[0].mxu0 }
 0x22c   :  { %v205_v43 = vadd.f32 %v231_v41, %v204_v42  ;;  %v244_v44 = vpop.f32.mrb[1].mxu0 }
 0x22d   :  { %v207_v45 = vpop.f32.mrb[2].mxu0 }
 0x22e   :  { %210 = vst [vmem:[#allocation3] sm:$0x3] %v205_v43  ;;  %v245_v46 = vpop.f32.mrb[3].mxu0 }
 0x22f   :  { %264 = shalt.err (!%p261_p4)
}
 0x230   :  { %s265_s4 = scalar_lea.hbm %s351_s5, 32 }
 0x231   :  { %p266_p5 = scmp.ne.s32.totalorder %s351_s5, %s265_s4  ;;  %p269_p6 = scmp.lt.u32.totalorder %s265_s4, %s351_s5 }
 0x233   :  { %p271_p7 = pnand %p269_p6, %p266_p5 }
 0x235   :  { %274 = shalt.err (!%p271_p7)
}
 0x236   :  { %220 = dma.vmem_to_hbm [thread:$0]  %s218_s29, 32, %s351_s5, [#allocation4]  }
 0x237   :  { %275 = dma.done.wait [#allocation4], 32  }
 0x238   :  { %276 = vsyncadd [#allocation4], 4294967264 }
 0x239   :  { %224 = vsyncpa [#allocation4], 1 }

// kernel: vit_forward.2
= control target key start
LH: loop header
LB: loop body
LE: loop exit
PB: predicated region body
PF: predicated region fallthrough
CT: control target
= control target key end

     0   :  { %vm64_vm0 = vcmask 523264   ;;  %vm181_vm1 = vcmask 257024   ;;  %vm182_vm2 = vsmask.f32 7938  ;;  %vm138_vm3 = vsmask.f32 256  ;;  %s380_s1 = inlined_call_operand.vmem [shape: bf16[64,32], index: 1, kind: input, shape index: {}]   ;;  %s381_s0 = inlined_call_operand.vmem [shape: bf16[2,16,64], index: 0, kind: input, shape index: {}]   ;;  %s382_s3 = inlined_call_operand.vmem [shape: f32[16,32], index: 3, kind: input, shape index: {}]   ;;  %s383_s4 = inlined_call_operand.vmem [shape: bf16[2,17,32], index: 4, kind: output, shape index: {}]   ;;  %s384_s2 = inlined_call_operand.vmem [shape: f32[1,32], index: 2, kind: input, shape index: {}]  }
   0x1   :  { %v247_v0 = vld [vmem:[%s380_s1] sm:$0xff]   ;;  %v248_v1 = vld [vmem:[%s380_s1 + $0x8] sm:$0xff]   ;;  %v249_v2 = vld [vmem:[%s380_s1 + $0x10] sm:$0xff]   ;;  %vm139_vm4 = vsmask.f32 4368  ;;  %vm189_vm5 = vcmask 253952  }
   0x2   :  { %235 = vmatprep.subr.bf16.mxu0 %v247_v0  ;;  %v251_v3 = vld [vmem:[%s381_s0] sm:$0xff]   ;;  %v250_v4 = vld [vmem:[%s380_s1 + $0x18] sm:$0xff]   ;;  %v252_v5 = vld [vmem:[%s381_s0 + $0x8] sm:$0xff]  }
   0x3   :  { %236 = vmatpush3.bf16.msra.mxu0 %v247_v0  ;;  %243 = vmatprep.mubr.msk.bf16.mxu0 %vm64_vm0, %v251_v3  ;;  %v120_v6 = vld [vmem:[%s382_s3] sm:$0xff]  ;;  %v121_v8 = vld [vmem:[%s382_s3 + $0x8] sm:$0xff]  ;;  %vm303_vm6 = vmand %vm181_vm1, %vm182_vm2 }
   0x4   :  { %237 = vmatprep.subr.bf16.mxu0 %v248_v1  ;;  %v194_v26 = vld [vmem:[%s383_s4 + $0xc] sm:$0xf]  ;;  %v184_v31 = vld [vmem:[%s383_s4] sm:$0xf]  ;;  %vm314_vm7 = vmor %vm138_vm3, %vm139_vm4 }
   0x5   :  { %vm319_vm8 = vmand %vm189_vm5, %vm138_vm3  ;;  %v198_v37 = vld [vmem:[%s383_s4 + $0x14] sm:$0x1]  ;;  %v191_v44 = vld [vmem:[%s383_s4 + $0x8] sm:$0x1] }
   0x6   :  { %v201_v51 = vld [vmem:[%s384_s2] sm:$0x1] }
   0x7   :  { %238 = vmatpush3.bf16.msra.mxu0 %v248_v1  ;;  %v202_v54 = vpack.c.bf16 %v201_v51, %v201_v51 }
   0x8   :  { %239 = vmatprep.subr.bf16.mxu0 %v249_v2 }
   0xb   :  { %240 = vmatpush3.bf16.msra.mxu0 %v249_v2 }
   0xc   :  { %241 = vmatprep.subr.bf16.mxu0 %v250_v4 }
   0xf   :  { %242 = vmatpush3.bf16.msra.mxu0 %v250_v4 }
  0x12   :  { %244 = vmatmul.mubr.msk.bf16.vlgmr.msra.gmra.mrb[0].mxu0 %vm64_vm0, %v252_v5 }
  0xe5   :  { %v245_v7 = vpop.f32.mrb[0].mxu0 }
  0xe6   :  { %v124_v9 = vadd.f32 %v245_v7, %v120_v6  ;;  %v105_v10 = vpop.f32.mrb[1].mxu0 }
  0xe7   :  { %v122_v11 = vadd.f32 %v120_v6, %v105_v10  ;;  %v246_v12 = vpop.f32.mrb[2].mxu0 }
  0xe8   :  { %v227_v13 = vpack.c.bf16 %v124_v9, %v124_v9  ;;  %v125_v14 = vadd.f32 %v246_v12, %v121_v8  ;;  %v108_v15 = vpop.f32.mrb[3].mxu0 }
  0xe9   :  { %v225_v16 = vpack.c.bf16 %v122_v11, %v122_v11  ;;  %v123_v17 = vadd.f32 %v121_v8, %v108_v15 }
  0xea   :  { %v159_v18 = vshrl.u32 %v227_v13, 16  ;;  %v228_v19 = vpack.c.bf16 %v125_v14, %v125_v14  ;;  %v162_v23 = vshll.u32 %v227_v13, 16 }
  0xeb   :  { %v142_v20 = vshrl.u32 %v225_v16, 16  ;;  %v226_v21 = vpack.c.bf16 %v123_v17, %v123_v17  ;;  %v145_v28 = vshll.u32 %v225_v16, 16 }
  0xec   :  { %v161_v22 = vrot.slane %v159_v18, 7  ;;  %v167_v24 = vshrl.u32 %v228_v19, 16  ;;  %v170_v34 = vshll.u32 %v228_v19, 16 }
  0xed   :  { %v144_v27 = vrot.slane %v142_v20, 7  ;;  %v150_v29 = vshrl.u32 %v226_v21, 16  ;;  %v153_v39 = vshll.u32 %v226_v21, 16 }
  0xee   :  { %v164_v30 = vor.u32 %v162_v23, %v161_v22  ;;  %v169_v33 = vrot.slane %v167_v24, 7  ;;  %v165_v40 = vrot.slane %v161_v22, 4 }
  0xef   :  { %v147_v35 = vor.u32 %v145_v28, %v144_v27  ;;  %v152_v38 = vrot.slane %v150_v29, 7  ;;  %v148_v45 = vrot.slane %v144_v27, 4 }
  0xf0   :  { %v195_v41 = vsel %vm303_vm6, %v164_v30, %v194_v26  ;;  %v172_v42 = vor.u32 %v170_v34, %v169_v33  ;;  %v174_v43 = vrot.slane %v169_v33, 4 }
  0xf1   :  { %196 = vst [vmem:[%s383_s4 + $0xc] sm:$0xf] %v195_v41  ;;  %v185_v46 = vsel %vm303_vm6, %v147_v35, %v184_v31  ;;  %v155_v47 = vor.u32 %v153_v39, %v152_v38  ;;  %v157_v48 = vrot.slane %v152_v38, 4 }
  0xf2   :  { %186 = vst [vmem:[%s383_s4] sm:$0xf] %v185_v46  ;;  %v173_v49 = vsel %vm314_vm7, %v165_v40, %v172_v42  ;;  %v199_v50 = vsel %vm319_vm8, %v174_v43, %v198_v37 }
  0xf3   :  { %197 = vst.msk [vmem:[%s383_s4 + $0x10] sm:$0xf] %vm181_vm1, %v173_v49  ;;  %200 = vst [vmem:[%s383_s4 + $0x14] sm:$0x1] %v199_v50  ;;  %v156_v52 = vsel %vm314_vm7, %v148_v45, %v155_v47  ;;  %v192_v53 = vsel %vm319_vm8, %v157_v48, %v191_v44 }
  0xf4   :  { %188 = vst.msk [vmem:[%s383_s4 + $0x4] sm:$0xf] %vm181_vm1, %v156_v52  ;;  %193 = vst [vmem:[%s383_s4 + $0x8] sm:$0x1] %v192_v53 }
  0xf8   :  { %v206_v55 = vld [vmem:[%s383_s4 + $0xc] sm:$0x1] }
  0xf9   :  { %v203_v56 = vld [vmem:[%s383_s4] sm:$0x1]  ;;  %v207_v57 = vsel %vm319_vm8, %v202_v54, %v206_v55 }
  0xfa   :  { %v204_v58 = vsel %vm319_vm8, %v202_v54, %v203_v56  ;;  %208 = vst [vmem:[%s383_s4 + $0xc] sm:$0x1] %v207_v57 }
  0xfb   :  { %205 = vst [vmem:[%s383_s4] sm:$0x1] %v204_v58 }

</bundles_post_ra>
